<compile_context>
chip_gen: v5e
topology: v5e:2x2
jax: 0.10.0
libtpu: 0.0.40
codegen_flags: <defaults>
</compile_context>

<pallas_src>
import functools

import jax
import jax.numpy as jnp
from jax import lax
from jax.experimental import pallas as pl
from jax.experimental.pallas import tpu as pltpu


def _qnet_kernel(x_ref, w_ref, o_ref):
    # x_ref: (2, TILE_B)    w_ref: (32, 38) packed params    o_ref: (1, TILE_B)
    tile_b = x_ref.shape[1]

    # Unpack the single resident weight block (static slices; w2^T is
    # lane-aligned at offset 0 so the MXU operand needs no relayout).
    w2t = w_ref[:, 0:32]     # (32, 32)  fc2 weight^T
    w1t = w_ref[:, 32:34]    # (32, 2)   fc1 weight^T
    b1 = w_ref[:, 34:35]     # (32, 1)
    b2 = w_ref[:, 35:36]     # (32, 1)
    w3 = w_ref[:, 36:37]     # (32, 1)   fc3 weight
    b3 = w_ref[0:1, 37:38]   # (1, 1)    fc3 bias (column replicated)

    x = x_ref[...]           # (2, TILE_B)

    # fc1 + relu: K=2 contraction as two VPU FMAs (exact f32, no MXU waste).
    # Each x row is broadcast across sublanes exactly once (hoisted).
    x0 = jnp.broadcast_to(x[0:1, :], (32, tile_b))
    x1 = jnp.broadcast_to(x[1:2, :], (32, tile_b))
    h1 = jnp.maximum(w1t[:, 0:1] * x0 + w1t[:, 1:2] * x1 + b1, 0.0)   # (32, TILE_B)

    # fc2 + relu: 32x32 contraction on the MXU, full-f32 accumulation
    # (precision pinned so it matches the HIGHEST-precision reference).
    h2 = jnp.dot(w2t, h1, preferred_element_type=jnp.float32,
                 precision=lax.Precision.HIGHEST)
    h2 = jnp.maximum(h2 + b2, 0.0)                                    # (32, TILE_B)

    # fc3 (output width 1): VPU multiply + 32-wide sublane reduce (XLU),
    # cheaper than an N=1 MXU dot.
    out = jnp.sum(w3 * h2, axis=0, keepdims=True) + b3                # (1, TILE_B)
    o_ref[...] = out.astype(o_ref.dtype)


def _round_up(v, m):
    return ((v + m - 1) // m) * m


@functools.partial(jax.jit, static_argnames=("tile_b",))
def qnetwork_forward(x, params, tile_b=None):
    """Fused 3-layer MLP forward pass.

    x: (B, 2) float32
    params: dict with w1 (2,32), b1 (1,32), w2 (32,32), b2 (1,32),
            w3 (32,1), b3 (1,1)
    returns: (B, 1) float32
    """
    B = x.shape[0]
    if tile_b is None:
        # 1-2 grid steps for small/medium B; cap at 512 lanes so the
        # (32, tile_b) f32 temporaries stay ~32 vregs (no Mosaic spills).
        tile_b = max(128, min(512, _round_up(-(-B // 2), 128)))
    n_tiles = pl.cdiv(B, tile_b)
    padded_b = n_tiles * tile_b

    # Batch onto the lane axis (layout plumbing, not compute).
    x_t = x.T                                                  # (2, B)
    if padded_b != B:
        # Padded columns compute ReLU(bias) garbage and are sliced off below;
        # nothing in the kernel reduces over the batch axis.
        x_t = jnp.pad(x_t, ((0, 0), (0, padded_b - B)))

    # Pack every weight/bias into one (32, 38) resident block => a single
    # contiguous HBM->VMEM DMA instead of six tiny strided ones.
    packed = jnp.concatenate(
        [
            params["w2"].T,                            # lanes  0:32
            params["w1"].T,                            # lanes 32:34
            params["b1"].T,                            # lane  34
            params["b2"].T,                            # lane  35
            params["w3"],                              # lane  36
            jnp.broadcast_to(params["b3"], (32, 1)),   # lane  37
        ],
        axis=1,
    ).astype(jnp.float32)                              # (32, 38)

    flops = 2 * padded_b * (2 * 32 + 32 * 32 + 32)
    bytes_accessed = 4 * (padded_b * (2 + 1) + 32 * 38)

    out_t = pl.pallas_call(
        _qnet_kernel,
        out_shape=jax.ShapeDtypeStruct((1, padded_b), jnp.float32),
        grid_spec=pltpu.PrefetchScalarGridSpec(
            num_scalar_prefetch=0,
            grid=(n_tiles,),
            in_specs=[
                pl.BlockSpec((2, tile_b), lambda i: (0, i)),   # x tile (lane-dense)
                pl.BlockSpec((32, 38), lambda i: (0, 0)),      # packed params (resident)
            ],
            out_specs=pl.BlockSpec((1, tile_b), lambda i: (0, i)),
        ),
        compiler_params=pltpu.CompilerParams(
            # Batch tiles are independent -> v7x can split them across 2 TCs.
            dimension_semantics=("parallel",),
            # VMEM is not the constraint for this kernel on any generation
            # (v5e/v6e 128 MiB, v7x 64 MiB); 32 MiB scoped limit is plenty.
            vmem_limit_bytes=32 * 1024 * 1024,
        ),
        cost_estimate=pl.CostEstimate(
            flops=flops, transcendentals=0, bytes_accessed=bytes_accessed),
    )(x_t, packed)

    return out_t[:, :B].T                                      # (B, 1)


def init_params(key):
    """Deterministic init matching nn.Linear's U(-1/sqrt(fan_in), 1/sqrt(fan_in))."""
    def linear_init(k, fan_in, fan_out):
        kw, kb = jax.random.split(k)
        bound = 1.0 / jnp.sqrt(fan_in)
        w = jax.random.uniform(kw, (fan_in, fan_out), jnp.float32, -bound, bound)
        b = jax.random.uniform(kb, (1, fan_out), jnp.float32, -bound, bound)
        return w, b

    k1, k2, k3 = jax.random.split(key, 3)
    w1, b1 = linear_init(k1, 2, 32)
    w2, b2 = linear_init(k2, 32, 32)
    w3, b3 = linear_init(k3, 32, 1)
    return dict(w1=w1, b1=b1, w2=w2, b2=b2, w3=w3, b3=b3)


def reference_forward(x, p):
    hi = lax.Precision.HIGHEST
    h1 = jnp.maximum(jnp.dot(x, p["w1"], precision=hi) + p["b1"], 0.0)
    h2 = jnp.maximum(jnp.dot(h1, p["w2"], precision=hi) + p["b2"], 0.0)
    return jnp.dot(h2, p["w3"], precision=hi) + p["b3"]


if __name__ == "__main__":
    key = jax.random.PRNGKey(0)
    pkey, xkey = jax.random.split(key)

    params = init_params(pkey)
    # 1000 rows: not a multiple of the tile, so this exercises the 2-step
    # ("parallel") grid and the ragged-tail padding path.
    B = 1000
    x = jax.random.normal(xkey, (B, 2), dtype=jnp.float32)

    out = qnetwork_forward(x, params)
    out = jax.block_until_ready(out)

    ref = reference_forward(x, params)
    assert out.shape == (B, 1), out.shape
    assert jnp.allclose(out, ref, atol=1e-4, rtol=1e-4), "mismatch vs reference"

    print("KERNEL_OK")
</pallas_src>

<mosaic_0001>
module attributes {stable_mosaic.version = 11 : i64} {
  func.func @_qnet_kernel(%arg0: i32, %arg1: memref<2x512xf32, #tpu.memory_space<vmem>>, %arg2: memref<32x38xf32, #tpu.memory_space<vmem>>, %arg3: memref<1x512xf32, #tpu.memory_space<vmem>>) attributes {dimension_semantics = [#tpu.dimension_semantics<parallel>], iteration_bounds = array<i64: 2>, scalar_prefetch = 0 : i64, scratch_operands = 0 : i64, tpu.core_type = #tpu.core_type<tc>, window_params = [{transform_indices = @transform_0, window_bounds = array<i64: 2, 512>}, {pipeline_mode = #tpu.pipeline_mode<synchronous>, transform_indices = @transform_1, window_bounds = array<i64: 32, 38>}, {transform_indices = @transform_2, window_bounds = array<i64: 1, 512>}]} {
    %c0 = arith.constant 0 : index
    %c0_0 = arith.constant 0 : index
    %0 = vector.load %arg2[%c0, %c0_0] : memref<32x38xf32, #tpu.memory_space<vmem>>, vector<32x32xf32>
    %c0_1 = arith.constant 0 : index
    %c32 = arith.constant 32 : index
    %1 = vector.load %arg2[%c0_1, %c32] : memref<32x38xf32, #tpu.memory_space<vmem>>, vector<32x2xf32>
    %c0_2 = arith.constant 0 : index
    %c34 = arith.constant 34 : index
    %2 = vector.load %arg2[%c0_2, %c34] : memref<32x38xf32, #tpu.memory_space<vmem>>, vector<32x1xf32>
    %c0_3 = arith.constant 0 : index
    %c35 = arith.constant 35 : index
    %3 = vector.load %arg2[%c0_3, %c35] : memref<32x38xf32, #tpu.memory_space<vmem>>, vector<32x1xf32>
    %c0_4 = arith.constant 0 : index
    %c36 = arith.constant 36 : index
    %4 = vector.load %arg2[%c0_4, %c36] : memref<32x38xf32, #tpu.memory_space<vmem>>, vector<32x1xf32>
    %c0_5 = arith.constant 0 : index
    %c37 = arith.constant 37 : index
    %5 = vector.load %arg2[%c0_5, %c37] : memref<32x38xf32, #tpu.memory_space<vmem>>, vector<1x1xf32>
    %c0_6 = arith.constant 0 : index
    %c0_7 = arith.constant 0 : index
    %6 = vector.load %arg1[%c0_6, %c0_7] : memref<2x512xf32, #tpu.memory_space<vmem>>, vector<2x512xf32>
    %7 = vector.extract_strided_slice %6 {offsets = [0, 0], sizes = [1, 512], strides = [1, 1]} : vector<2x512xf32> to vector<1x512xf32>
    %8 = vector.shape_cast %7 : vector<1x512xf32> to vector<1x512xf32>
    %9 = vector.broadcast %8 : vector<1x512xf32> to vector<32x512xf32>
    %10 = vector.extract_strided_slice %6 {offsets = [1, 0], sizes = [1, 512], strides = [1, 1]} : vector<2x512xf32> to vector<1x512xf32>
    %11 = vector.shape_cast %10 : vector<1x512xf32> to vector<1x512xf32>
    %12 = vector.broadcast %11 : vector<1x512xf32> to vector<32x512xf32>
    %13 = vector.extract_strided_slice %1 {offsets = [0, 0], sizes = [32, 1], strides = [1, 1]} : vector<32x2xf32> to vector<32x1xf32>
    %14 = vector.broadcast %13 : vector<32x1xf32> to vector<32x512xf32>
    %15 = arith.mulf %14, %9 : vector<32x512xf32>
    %16 = vector.extract_strided_slice %1 {offsets = [0, 1], sizes = [32, 1], strides = [1, 1]} : vector<32x2xf32> to vector<32x1xf32>
    %17 = vector.broadcast %16 : vector<32x1xf32> to vector<32x512xf32>
    %18 = arith.mulf %17, %12 : vector<32x512xf32>
    %19 = arith.addf %15, %18 : vector<32x512xf32>
    %20 = vector.broadcast %2 : vector<32x1xf32> to vector<32x512xf32>
    %21 = arith.addf %19, %20 : vector<32x512xf32>
    %cst = arith.constant 0.000000e+00 : f32
    %22 = vector.broadcast %cst : f32 to vector<32x512xf32>
    %23 = arith.maximumf %21, %22 : vector<32x512xf32>
    %cst_8 = arith.constant dense<0.000000e+00> : vector<32x512xf32>
    %24 = tpu.matmul %0, %23, %cst_8 {dimension_numbers = #tpu.dot_dimension_numbers<[1], [0], [0], [1], [0, 0, 1, 1], [], []>, precision = #tpu.contract_precision<fp32>} : vector<32x32xf32>, vector<32x512xf32>, vector<32x512xf32> -> vector<32x512xf32>
    %25 = vector.broadcast %3 : vector<32x1xf32> to vector<32x512xf32>
    %26 = arith.addf %24, %25 : vector<32x512xf32>
    %cst_9 = arith.constant 0.000000e+00 : f32
    %27 = vector.broadcast %cst_9 : f32 to vector<32x512xf32>
    %28 = arith.maximumf %26, %27 : vector<32x512xf32>
    %29 = vector.broadcast %4 : vector<32x1xf32> to vector<32x512xf32>
    %30 = arith.mulf %29, %28 : vector<32x512xf32>
    %cst_10 = arith.constant dense<0.000000e+00> : vector<512xf32>
    %31 = vector.multi_reduction <add>, %30, %cst_10 [0] : vector<32x512xf32> to vector<512xf32>
    %32 = vector.shape_cast %31 : vector<512xf32> to vector<1x512xf32>
    %33 = vector.broadcast %5 : vector<1x1xf32> to vector<1x512xf32>
    %34 = arith.addf %32, %33 : vector<1x512xf32>
    %c0_11 = arith.constant 0 : index
    %c0_12 = arith.constant 0 : index
    %35 = vector.load %arg3[%c0_11, %c0_12] : memref<1x512xf32, #tpu.memory_space<vmem>>, vector<1x512xf32>
    tpu.vector_store %arg3[%c0_11, %c0_12], %34 {strides = array<i32>} : memref<1x512xf32, #tpu.memory_space<vmem>>, vector<1x512xf32>,
    return
  }
  func.func @transform_0(%arg0: i32) -> (i32, i32) {
    %c0_i32 = arith.constant 0 : i32
    %c0_i32_0 = arith.constant 0 : i32
    return %c0_i32, %arg0 : i32, i32
  }
  func.func @transform_1(%arg0: i32) -> (i32, i32) {
    %c0_i32 = arith.constant 0 : i32
    %c0_i32_0 = arith.constant 0 : i32
    %c0_i32_1 = arith.constant 0 : i32
    return %c0_i32, %c0_i32_0 : i32, i32
  }
  func.func @transform_2(%arg0: i32) -> (i32, i32) {
    %c0_i32 = arith.constant 0 : i32
    %c0_i32_0 = arith.constant 0 : i32
    return %c0_i32, %arg0 : i32, i32
  }
}

</mosaic_0001>

<bundles_post_ra>
// kernel: qnetwork_forward.1
= control target key start
LH: loop header
LB: loop body
LE: loop exit
PB: predicated region body
PF: predicated region fallthrough
CT: control target
= control target key end

     0   :  { %s1677_s9 = smov 0   ;;  %s2239_s0 = inlined_call_operand.vmem [shape: f32[2,1024], index: 0, kind: input, shape index: {}]   ;;  %s2240_s1 = inlined_call_operand.vmem [shape: f32[32,38], index: 1, kind: input, shape index: {}]   ;;  %s2241_s2 = inlined_call_operand.vmem [shape: f32[1,1024], index: 2, kind: output, shape index: {}]  }
   0x1 LB: > { %s1607_s10 = sadd.s32 4294967295, %s1654_s9   ;;  %p1611_p0 = scmp.ge.s32.totalorder %s1654_s9, 1  ;;  %s1654_s9 = sphi %s1677_s9, %s12_s9  }
   0x2   : > { %p113_p1 = scmp.lt.s32.totalorder %s1654_s9, 3 }
   0x4   : > { %p114_p2 = pnand %p1611_p0, %p113_p1 }
   0x5   : > { %s1612_s19 = sshll.u32 (!%p114_p2), %s1607_s10, 2 }
   0x6   : > { %117 = sbr.rel (%p114_p2) target bundleno = 523 (0x20b), region = 28  ;;  %p135_p3 = scmp.lt.s32.totalorder (!%p114_p2), %s1612_s19, 7 }
   0xb   : > { %v1688_v0 = vld [vmem:[%s2240_s1 + $0x18] sm:$0xff]  ;;  %v1693_v1 = vld [vmem:[%s2240_s1 + $0x10] sm:$0xff]  ;;  %v1698_v2 = vld [vmem:[%s2240_s1 + $0x8] sm:$0xff]  ;;  %v1656_v3 = vmov 32   ;;  %v1657_v4 = vmov 33   ;;  %v1658_v6 = vmov 34  }
   0xc   : > { %1635 = vset.pattern.permute.xlu2 %v1656_v3  ;;  %1633 = vset.pattern.permute.xlu1 %v1656_v3  ;;  %v1709_v5 = vld [vmem:[%s2240_s1] sm:$0xff]  ;;  %s2243_s19 = smov (!%p135_p3, %s1612_s19), 7  ;;  %vm324_vm0 = vcmask 261120   ;;  %vm1545_vm1 = vcmask 1040384   ;;  %vm1547_vm2 = vcmask 1042434   ;;  %vm1549_vm3 = vcmask 1041408  }
   0xd   : > { %1631 = vset.pattern.permute.xlu0 %v1656_v3  ;;  %188 = vperm.xlu1 %1633, %v1693_v1   ;;  %s1613_s20 = sshll.u32 %s2243_s19, 1  ;;  %v325_v39 = vsel %vm324_vm0, %v1709_v5, 0  ;;  %s143_s28 = scalar_lea.vmem %s2241_s2, %s2243_s19 }
   0xe   : > { %193 = vperm.xlu0 %1631, %v1688_v0   ;;  %183 = vperm.xlu2 %1635, %v1698_v2   ;;  %s138_s23 = scalar_lea.vmem %s2239_s0, %s1613_s20  ;;  %v1770_v49 = vand.u32 4294901760, %v325_v39 }
   0xf   : > { %v1725_v7 = vld [vmem:[%s138_s23] sm:$0xff] }
  0x10   : > { %v155_v8 = vperm.slane %v1725_v7, 6  ;;  %v167_v12 = vperm.slane %v1725_v7, 7  ;;  %v152_v23 = vperm.slane %v1725_v7, 0  ;;  %v164_v24 = vperm.slane %v1725_v7, 1 }
  0x11   : > { %v153_v25 = vperm.slane %v1725_v7, 2  ;;  %v165_v26 = vperm.slane %v1725_v7, 3  ;;  %v1785_v60 = vsub.f32 %v325_v39, %v1770_v49 }
  0x12   : > { %v163_v9 = vperm.slane %v155_v8, 0  ;;  %v175_v13 = vperm.slane %v167_v12, 1  ;;  %v160_v27 = vperm.slane %v152_v23, 0  ;;  %v172_v28 = vperm.slane %v164_v24, 1 }
  0x13   : > { %v161_v29 = vperm.slane %v153_v25, 0  ;;  %v173_v30 = vperm.slane %v165_v26, 1 }
  0x15   : > { %1634 = vset.pattern.permute.xlu1 %v1657_v4 }
  0x16   : > { %1632 = vset.pattern.permute.xlu0 %v1657_v4  ;;  %1636 = vset.pattern.permute.xlu2 %v1657_v4 }
  0x17   : > { %225 = vperm.xlu0 %1632, %v1688_v0   ;;  %221 = vperm.xlu1 %1634, %v1693_v1  }
  0x18   : > { %217 = vperm.xlu2 %1636, %v1698_v2  }
  0x1f   : > { %1637 = vset.pattern.permute.xlu1 %v1658_v6  ;;  %213 = vperm.xlu0 %1632, %v1709_v5  }
  0x20   : > { %1638 = vset.pattern.permute.xlu2 %v1656_v3  ;;  %273 = vperm.xlu1 %1637, %v1688_v0  }
  0x21   : > { %178 = vperm.xlu2 %1638, %v1709_v5  }
  0x27   : > { %1640 = vset.pattern.permute.xlu0 %v1658_v6 }
  0x28   : > { %269 = vperm.xlu1 %1637, %v1693_v1   ;;  %261 = vperm.xlu0 %1640, %v1709_v5  }
  0x29   : > { %1639 = vset.pattern.permute.xlu2 %v1658_v6 }
  0x2a   : > { %265 = vperm.xlu2 %1639, %v1698_v2  }
  0x68   : > { %v1728_v10 = vpop.permute.xlu2 %183 }
  0x69   : > { %v203_v11 = vmul.f32 %v1728_v10, %v163_v9  ;;  %v200_v33 = vmul.f32 %v1728_v10, %v160_v27  ;;  %v201_v36 = vmul.f32 %v1728_v10, %v161_v29 }
  0x72   : > { %v1732_v14 = vpop.permute.xlu2 %217 }
  0x73   : > { %v235_v15 = vmul.f32 %v1732_v14, %v175_v13  ;;  %v232_v34 = vmul.f32 %v1732_v14, %v172_v28  ;;  %v233_v37 = vmul.f32 %v1732_v14, %v173_v30 }
  0x75   : > { %v1735_v16 = vadd.f32 %v235_v15, %v203_v11  ;;  %v248_v43 = vadd.f32 %v232_v34, %v200_v33  ;;  %v249_v48 = vadd.f32 %v233_v37, %v201_v36 }
  0x7b   : > { %v1737_v17 = vpop.permute.xlu2 %178 }
  0x7c   : > { %v199_v18 = vmul.f32 %v1737_v17, %v163_v9  ;;  %v196_v61 = vmul.f32 %v1737_v17, %v160_v27  ;;  %v197_v8 = vmul.f32 %v1737_v17, %v161_v29 }
  0x7f   : > { %v1740_v19 = vpop.permute.xlu1 %188 }
  0x80   : > { %v207_v20 = vmul.f32 %v1740_v19, %v163_v9  ;;  %v1743_v21 = vpop.permute.xlu0 %193  ;;  %v205_v15 = vmul.f32 %v1740_v19, %v161_v29 }
  0x81   : > { %v211_v22 = vmul.f32 %v1743_v21, %v163_v9  ;;  %v208_v45 = vmul.f32 %v1743_v21, %v160_v27  ;;  %v209_v46 = vmul.f32 %v1743_v21, %v161_v29 }
  0x84   : > { %v1768_v47 = vpop.permute.xlu2 %265 }
  0x85   : > { %v280_v53 = vadd.f32 %v1768_v47, %v248_v43  ;;  %v281_v56 = vadd.f32 %v1768_v47, %v249_v48 }
  0x87   : > { %v296_v9 = vmax.f32 %v280_v53, 0.0 }
  0x89   : > { %v1750_v31 = vpop.permute.xlu0 %225  ;;  %v1752_v32 = vpop.permute.xlu1 %221  ;;  %v1815_v34 = vand.u32 4294901760, %v296_v9 }
  0x8a   : > { %v243_v35 = vmul.f32 %v1750_v31, %v175_v13  ;;  %v239_v38 = vmul.f32 %v1752_v32, %v175_v13  ;;  %v240_v40 = vmul.f32 %v1750_v31, %v172_v28  ;;  %v241_v41 = vmul.f32 %v1750_v31, %v173_v30 }
  0x8b   : > { %v236_v63 = vmul.f32 %v1752_v32, %v172_v28  ;;  %v237_v3 = vmul.f32 %v1752_v32, %v173_v30 }
  0x8c   : > { %v259_v42 = vadd.f32 %v243_v35, %v211_v22  ;;  %v1764_v44 = vadd.f32 %v239_v38, %v207_v20  ;;  %v256_v51 = vadd.f32 %v240_v40, %v208_v45  ;;  %v257_v52 = vadd.f32 %v241_v41, %v209_v46 }
  0x8d   : > { %v297_v20 = vmax.f32 %v281_v56, 0.0  ;;  %v327_v22 = vsel %vm324_vm0, %v1698_v2, 0  ;;  %v253_v25 = vadd.f32 %v237_v3, %v205_v15  ;;  %v1659_v41 = vmov 35  }
  0x8e   : > { %1641 = vset.pattern.permute.xlu1 %v1659_v41  ;;  %1642 = vset.pattern.permute.xlu2 %v1659_v41 }
  0x8f   : > { %v1817_v35 = vand.u32 4294901760, %v297_v20  ;;  %309 = vperm.xlu1 %1641, %v1709_v5   ;;  %313 = vperm.xlu2 %1642, %v1698_v2  }
  0x91   : > { %v1772_v50 = vpop.permute.xlu0 %213 }
  0x92   : > { %v231_v54 = vmul.f32 %v1772_v50, %v175_v13  ;;  %v1776_v55 = vpop.permute.xlu1 %273  ;;  %v228_v11 = vmul.f32 %v1772_v50, %v172_v28  ;;  %v229_v12 = vmul.f32 %v1772_v50, %v173_v30  ;;  %v204_v13 = vmul.f32 %v1740_v19, %v160_v27 }
  0x93   : > { %v288_v57 = vadd.f32 %v1776_v55, %v256_v51  ;;  %v289_v58 = vadd.f32 %v1776_v55, %v257_v52  ;;  %v1782_v59 = vadd.f32 %v1776_v55, %v259_v42  ;;  %v1809_v27 = vand.u32 4294901760, %v1785_v60 }
  0x94   : > { %v1788_v62 = vadd.f32 %v231_v54, %v199_v18  ;;  %v252_v24 = vadd.f32 %v236_v63, %v204_v13  ;;  %v244_v30 = vadd.f32 %v228_v11, %v196_v61  ;;  %v245_v33 = vadd.f32 %v229_v12, %v197_v8 }
  0x95   : > { %v304_v4 = vmax.f32 %v288_v57, 0.0  ;;  %v305_v6 = vmax.f32 %v289_v58, 0.0  ;;  %v1827_v42 = vand.u32 4294901760, %v327_v22  ;;  %v356_v46 = vsub.f32 %v1785_v60, %v1809_v27 }
  0x96   : > { %v411_v52 = vsub.f32 %v296_v9, %v1815_v34  ;;  %v1840_v57 = vsub.f32 %v297_v20, %v1817_v35 }
  0x97   : > { %v1797_v18 = vand.u32 4294901760, %v304_v4  ;;  %v1801_v23 = vand.u32 4294901760, %v305_v6  ;;  %v1848_v3 = vsub.f32 %v327_v22, %v1827_v42  ;;  %v1854_v8 = vand.u32 4294901760, %v356_v46  ;;  %317 = vperm.xlu1 %1641, %v1693_v1   ;;  %321 = vperm.xlu2 %1642, %v1688_v0  }
  0x98   : > { %v412_v13 = vand.u32 4294901760, %v411_v52  ;;  %v690_v22 = vand.u32 4294901760, %v1840_v57 }
  0x99   : > { %346 = vmatpush.msra.mxu0 %v1797_v18  ;;  %497 = vmatpush.msra.mxu3 %v1797_v18  ;;  %v1806_v26 = vsub.f32 %v304_v4, %v1797_v18  ;;  %v1825_v40 = vsub.f32 %v305_v6, %v1801_v23 }
  0x9a   : > { %v1811_v28 = vpop.permute.xlu1 %269  ;;  %v1813_v29 = vpop.permute.xlu0 %261  ;;  %v413_v41 = vsub.f32 %v411_v52, %v412_v13  ;;  %v691_v46 = vsub.f32 %v1840_v57, %v690_v22 }
  0x9b   : > { %v284_v36 = vadd.f32 %v1811_v28, %v252_v24  ;;  %v285_v37 = vadd.f32 %v1811_v28, %v253_v25  ;;  %453 = vmatpush.msra.mxu2 %v1806_v26  ;;  %v276_v38 = vadd.f32 %v1813_v29, %v244_v30  ;;  %v277_v39 = vadd.f32 %v1813_v29, %v245_v33 }
  0x9c   : > { %v400_v56 = vand.u32 4294901760, %v1806_v26  ;;  %v678_v63 = vand.u32 4294901760, %v1825_v40  ;;  %v329_v25 = vsel %vm324_vm0, %v1693_v1, 0 }
  0x9d   : > { %v300_v43 = vmax.f32 %v284_v36, 0.0  ;;  %v301_v45 = vmax.f32 %v285_v37, 0.0  ;;  %v292_v48 = vmax.f32 %v276_v38, 0.0  ;;  %v293_v51 = vmax.f32 %v277_v39, 0.0 }
  0x9e   : > { %v401_v4 = vsub.f32 %v1806_v26, %v400_v56  ;;  %v679_v9 = vsub.f32 %v1825_v40, %v678_v63  ;;  %v1875_v37 = vand.u32 4294901760, %v1848_v3 }
  0x9f   : > { %v1834_v53 = vand.u32 4294901760, %v301_v45  ;;  %v1836_v54 = vand.u32 4294901760, %v300_v43  ;;  %v1842_v58 = vand.u32 4294901760, %v293_v51  ;;  %v1844_v61 = vand.u32 4294901760, %v292_v48 }
  0xa0   : > { %v402_v15 = vand.u32 4294901760, %v401_v4  ;;  %v680_v38 = vand.u32 4294901760, %v679_v9  ;;  %v364_v4 = vsub.f32 %v1848_v3, %v1875_v37 }
  0xa1   : > { %348 = vmatpush.msra.mxu0 %v1836_v54  ;;  %499 = vmatpush.msra.mxu3 %v1836_v54  ;;  %v405_v6 = vsub.f32 %v300_v43, %v1836_v54  ;;  %v417_v11 = vsub.f32 %v292_v48, %v1844_v61  ;;  %v1861_v12 = vsub.f32 %v301_v45, %v1834_v53  ;;  %v1881_v43 = vand.u32 4294901760, %v329_v25 }
  0xa2   : > { %v1866_v24 = vsub.f32 %v293_v51, %v1842_v58  ;;  %403 = vmatpush.msra.mxu1 %v402_v15 }
  0xa3   : > { %350 = vmatpush.msra.mxu0 %v1815_v34  ;;  %456 = vmatpush.msra.mxu2 %v405_v6  ;;  %v406_v20 = vand.u32 4294901760, %v405_v6  ;;  %v684_v26 = vand.u32 4294901760, %v1861_v12  ;;  %v418_v30 = vand.u32 4294901760, %v417_v11  ;;  %v1895_v9 = vsub.f32 %v329_v25, %v1881_v43 }
  0xa4   : > { %501 = vmatpush.msra.mxu3 %v1815_v34  ;;  %v696_v36 = vand.u32 4294901760, %v1866_v24  ;;  %v166_v25 = vperm.slane %v1725_v7, 5 }
  0xa5   : > { %352 = vmatpush.msra.mxu0 %v1844_v61  ;;  %v407_v33 = vsub.f32 %v405_v6, %v406_v20  ;;  %459 = vmatpush.msra.mxu2 %v411_v52  ;;  %v685_v39 = vsub.f32 %v1861_v12, %v684_v26  ;;  %v419_v51 = vsub.f32 %v417_v11, %v418_v30  ;;  %v414_v6 = vand.u32 4294901760, %v413_v41 }
  0xa6   : > { %503 = vmatpush.msra.mxu3 %v1844_v61  ;;  %358 = vmatmul.f32.vlgmr.msra.gmra.mxu0 %v1854_v8  ;;  %v697_v52 = vsub.f32 %v1866_v24, %v696_v36 }
  0xa7   : > { %507 = vmatmul.f32.vlgmr.msra.gmra.mxu3 %v1809_v27  ;;  %v408_v45 = vand.u32 4294901760, %v407_v33  ;;  %544 = vmatpush.msrb.mxu0 %v400_v56  ;;  %v686_v48 = vand.u32 4294901760, %v685_v39  ;;  %v692_v56 = vand.u32 4294901760, %v691_v46  ;;  %v420_v15 = vand.u32 4294901760, %v419_v51 }
  0xa8   : > { %681 = vmatpush.msrb.mxu3 %v680_v38  ;;  %462 = vmatpush.msra.mxu2 %v417_v11  ;;  %v331_v11 = vsel %vm324_vm0, %v1688_v0, 0  ;;  %v698_v33 = vand.u32 4294901760, %v697_v52  ;;  %v1901_v38 = vand.u32 4294901760, %v364_v4 }
  0xa9   : > { %409 = vmatpush.msra.mxu1 %v408_v45  ;;  %465 = vmatmul.f32.vlgmr.msra.gmra.mxu2 %v1785_v60  ;;  %v1905_v39 = vand.u32 4294901760, %v331_v11 }
  0xaa   : > { %548 = vmatpush.msrb.mxu0 %v406_v20  ;;  %624 = vmatpush.msrb.mxu2 %v1801_v23  ;;  %v154_v20 = vperm.slane %v1725_v7, 4  ;;  %v174_v7 = vperm.slane %v166_v25, 1 }
  0xab   : > { %687 = vmatpush.msrb.mxu3 %v686_v48  ;;  %415 = vmatpush.msra.mxu1 %v414_v6 }
  0xac   : > { %552 = vmatpush.msrb.mxu0 %v412_v13  ;;  %626 = vmatpush.msrb.mxu2 %v1834_v53  ;;  %v1909_v13 = vand.u32 4294901760, %v1895_v9  ;;  %v162_v41 = vperm.slane %v154_v20, 0  ;;  %v242_v46 = vmul.f32 %v1750_v31, %v174_v7  ;;  %v234_v48 = vmul.f32 %v1732_v14, %v174_v7 }
  0xad   : > { %693 = vmatpush.msrb.mxu3 %v692_v56  ;;  %421 = vmatpush.msra.mxu1 %v420_v15  ;;  %v238_v51 = vmul.f32 %v1752_v32, %v174_v7 }
  0xae   : > { %556 = vmatpush.msrb.mxu0 %v418_v30  ;;  %628 = vmatpush.msrb.mxu2 %v1817_v35  ;;  %v1918_v30 = vsub.f32 %v331_v11, %v1905_v39  ;;  %v372_v45 = vsub.f32 %v1895_v9, %v1909_v13 }
  0xaf   : > { %699 = vmatpush.msrb.mxu3 %v698_v33  ;;  %423 = vmatmul.f32.vlgmr.msra.gmra.mxu1 %v1770_v49 }
  0xb0   : > { %731 = vmatpush.msra.mxu0 %v1825_v40  ;;  %513 = vmatmul.f32.gmra.mxu3 %v1875_v37  ;;  %v210_v40 = vmul.f32 %v1743_v21, %v162_v41  ;;  %v1939_v31 = vand.u32 4294901760, %v372_v45  ;;  %v198_v21 = vmul.f32 %v1737_v17, %v162_v41  ;;  %v287_v45 = vadd.f32 %v1811_v28, %v1764_v44 }
  0xb1   : > { %366 = vmatmul.f32.gmra.mxu0 %v1901_v38  ;;  %587 = vmatpush.msrb.mxu1 %v1797_v18  ;;  %v202_v18 = vmul.f32 %v1728_v10, %v162_v41  ;;  %v206_v10 = vmul.f32 %v1740_v19, %v162_v41  ;;  %v230_v19 = vmul.f32 %v1772_v50, %v174_v7 }
  0xb2   : > { %630 = vmatpush.msrb.mxu2 %v1842_v58  ;;  %865 = vmatpush.msra.mxu3 %v1801_v23  ;;  %v258_v14 = vadd.f32 %v242_v46, %v210_v40  ;;  %v307_v46 = vmax.f32 %v1782_v59, 0.0  ;;  %v303_v40 = vmax.f32 %v287_v45, 0.0 }
  0xb3   : > { %734 = vmatpush.msra.mxu0 %v1861_v12  ;;  %589 = vmatpush.msrb.mxu1 %v1836_v54  ;;  %v1942_v54 = vand.u32 4294901760, %v1918_v30  ;;  %v250_v32 = vadd.f32 %v234_v48, %v202_v18  ;;  %v1660_v12 = vmov 36   ;;  %v283_v48 = vadd.f32 %v1768_v47, %v1735_v16 }
  0xb4   : > { %822 = vmatpush.msra.mxu2 %v678_v63  ;;  %867 = vmatpush.msra.mxu3 %v1834_v53  ;;  %v290_v63 = vadd.f32 %v1776_v55, %v258_v14  ;;  %v2043_v14 = vand.u32 4294901760, %v307_v46  ;;  %v2048_v59 = vand.u32 4294901760, %v303_v40 }
  0xb5   : > { %470 = vmatmul.f32.gmra.mxu2 %v1848_v3  ;;  %737 = vmatpush.msra.mxu0 %v1840_v57  ;;  %v380_v57 = vsub.f32 %v1918_v30, %v1942_v54  ;;  %v282_v50 = vadd.f32 %v1768_v47, %v250_v32  ;;  %v299_v44 = vmax.f32 %v283_v48, 0.0 }
  0xb6   : > { %826 = vmatpush.msra.mxu2 %v684_v26  ;;  %591 = vmatpush.msrb.mxu1 %v1815_v34  ;;  %v254_v34 = vadd.f32 %v238_v51, %v206_v10  ;;  %v306_v55 = vmax.f32 %v290_v63, 0.0  ;;  %v279_v10 = vadd.f32 %v1813_v29, %v1788_v62  ;;  %v2052_v16 = vsub.f32 %v307_v46, %v2043_v14 }
  0xb7   : > { %869 = vmatpush.msra.mxu3 %v1817_v35  ;;  %740 = vmatpush.msra.mxu0 %v1866_v24  ;;  %v298_v24 = vmax.f32 %v282_v50, 0.0  ;;  %v2054_v47 = vand.u32 4294901760, %v299_v44  ;;  %v2057_v62 = vsub.f32 %v303_v40, %v2048_v59 }
  0xb8   : > { %830 = vmatpush.msra.mxu2 %v690_v22  ;;  %593 = vmatpush.msrb.mxu1 %v1844_v61  ;;  %v286_v17 = vadd.f32 %v1811_v28, %v254_v34  ;;  %v1968_v61 = vand.u32 4294901760, %v380_v57  ;;  %v295_v28 = vmax.f32 %v279_v10, 0.0 }
  0xb9   : > { %871 = vmatpush.msra.mxu3 %v1842_v58  ;;  %374 = vmatmul.f32.gmra.mxu0 %v1939_v31  ;;  %v2064_v32 = vsub.f32 %v299_v44, %v2054_v47 }
  0xba   : > { %775 = vmatpush.msra.mxu1 %v1801_v23  ;;  %834 = vmatpush.msra.mxu2 %v696_v36  ;;  %v246_v23 = vadd.f32 %v230_v19, %v198_v21  ;;  %v1234_v21 = vand.u32 4294901760, %v2052_v16  ;;  %v1240_v19 = vand.u32 4294901760, %v2057_v62 }
  0xbb   : > { %427 = vmatmul.f32.gmra.mxu1 %v1827_v42  ;;  %519 = vmatmul.f32.gmra.mxu3 %v1909_v13  ;;  %v1246_v57 = vand.u32 4294901760, %v2064_v32 }
  0xbc   : > { %777 = vmatpush.msra.mxu1 %v1834_v53  ;;  %1643 = vset.pattern.permute.xlu0 %v1660_v12  ;;  %v302_v53 = vmax.f32 %v286_v17, 0.0  ;;  %v278_v22 = vadd.f32 %v1813_v29, %v246_v23  ;;  %v2059_v29 = vand.u32 4294901760, %v295_v28  ;;  %v1235_v63 = vsub.f32 %v2052_v16, %v1234_v21 }
  0xbd   : > { %475 = vmatmul.f32.gmra.mxu2 %v1895_v9  ;;  %1462 = vperm.xlu0 %1643, %v1709_v5   ;;  %v1241_v17 = vsub.f32 %v2057_v62, %v1240_v19  ;;  %v1247_v23 = vsub.f32 %v2064_v32, %v1246_v57 }
  0xbe   : > { %779 = vmatpush.msra.mxu1 %v1817_v35  ;;  %v1975_v35 = vand.u32 4294901760, %v306_v55  ;;  %v294_v26 = vmax.f32 %v278_v22, 0.0  ;;  %v1979_v36 = vand.u32 4294901760, %v302_v53  ;;  %1644 = vset.pattern.permute.xlu1 %v1660_v12  ;;  %v2069_v34 = vsub.f32 %v295_v28, %v2059_v29 }
  0xbf   : > { %1466 = vperm.xlu1 %1644, %v1698_v2   ;;  %1645 = vset.pattern.permute.xlu2 %v1660_v12  ;;  %v1242_v12 = vand.u32 4294901760, %v1241_v17  ;;  %v1248_v22 = vand.u32 4294901760, %v1247_v23 }
  0xc0   : > { %781 = vmatpush.msra.mxu1 %v1842_v58  ;;  %v1983_v5 = vsub.f32 %v306_v55, %v1975_v35  ;;  %v1985_v58 = vand.u32 4294901760, %v298_v24  ;;  %1470 = vperm.xlu2 %1645, %v1693_v1   ;;  %v1989_v52 = vsub.f32 %v302_v53, %v1979_v36  ;;  %v1991_v4 = vand.u32 4294901760, %v294_v26 }
  0xc1   : > { %382 = vmatmul.f32.gmra.mxu0 %v1968_v61  ;;  %v1252_v50 = vand.u32 4294901760, %v2069_v34  ;;  %v1236_v55 = vand.u32 4294901760, %v1235_v63 }
  0xc2   : > { %v1996_v6 = vsub.f32 %v298_v24, %v1985_v58  ;;  %v956_v2 = vand.u32 4294901760, %v1983_v5  ;;  %v2004_v1 = vsub.f32 %v294_v26, %v1991_v4  ;;  %v962_v56 = vand.u32 4294901760, %v1989_v52 }
  0xc3   : > { %431 = vmatmul.f32.gmra.mxu1 %v1881_v43  ;;  %525 = vmatmul.f32.gmra.mxu3 %v1942_v54  ;;  %v1253_v53 = vsub.f32 %v2069_v34, %v1252_v50  ;;  %v1661_v26 = vmov 37  }
  0xc4   : > { %v957_v11 = vsub.f32 %v1983_v5, %v956_v2  ;;  %v968_v15 = vand.u32 4294901760, %v1996_v6  ;;  %v963_v33 = vsub.f32 %v1989_v52, %v962_v56  ;;  %v974_v20 = vand.u32 4294901760, %v2004_v1 }
  0xc5   : > { %480 = vmatmul.f32.gmra.mxu2 %v1918_v30  ;;  %v1254_v24 = vand.u32 4294901760, %v1253_v53  ;;  %1647 = vset.pattern.permute.xlu0 %v1661_v26 }
  0xc6   : > { %v969_v25 = vsub.f32 %v1996_v6, %v968_v15  ;;  %v964_v41 = vand.u32 4294901760, %v963_v33  ;;  %v975_v7 = vsub.f32 %v2004_v1, %v974_v20 }
  0xc7   : > { %1474 = vperm.xlu1 %1644, %v1688_v0   ;;  %v958_v0 = vand.u32 4294901760, %v957_v11 }
  0xc8   : > { %v970_v18 = vand.u32 4294901760, %v969_v25  ;;  %v976_v51 = vand.u32 4294901760, %v975_v7  ;;  %1646 = vset.pattern.permute.xlu2 %v1661_v26 }
  0xc9   : > { %558 = vmatmul.f32.vlgmr.msrb.gmra.mxu0 %v1770_v49 }
  0xca   : > { %902 = vmatpush.msrb.mxu0 %v1975_v35 }
  0xcb   : > { %435 = vmatmul.f32.gmra.mxu1 %v1905_v39  ;;  %701 = vmatmul.f32.vlgmr.msrb.gmra.mxu3 %v1770_v49 }
  0xcc   : > { %1053 = vmatpush.msrb.mxu3 %v1975_v35  ;;  %904 = vmatpush.msrb.mxu0 %v1979_v36 }
  0xcd   : > { %636 = vmatmul.f32.vlgmr.msrb.gmra.mxu2 %v1854_v8 }
  0xce   : > { %1009 = vmatpush.msrb.mxu2 %v1983_v5  ;;  %1055 = vmatpush.msrb.mxu3 %v1979_v36 }
  0xcf   : > { %906 = vmatpush.msrb.mxu0 %v1985_v58 }
  0xd0   : > { %1012 = vmatpush.msrb.mxu2 %v1989_v52  ;;  %1057 = vmatpush.msrb.mxu3 %v1985_v58 }
  0xd1   : > { %908 = vmatpush.msrb.mxu0 %v1991_v4 }
  0xd2   : > { %1015 = vmatpush.msrb.mxu2 %v1996_v6  ;;  %1059 = vmatpush.msrb.mxu3 %v1991_v4 }
  0xd3   : > { %562 = vmatmul.f32.gmra.mxu0 %v1827_v42  ;;  %595 = vmatmul.f32.vlgmr.msrb.gmra.mxu1 %v1770_v49 }
  0xd4   : > { %705 = vmatmul.f32.gmra.mxu3 %v1827_v42  ;;  %959 = vmatpush.msrb.mxu1 %v958_v0 }
  0xd5   : > { %1018 = vmatpush.msrb.mxu2 %v2004_v1 }
  0xd6   : > { %644 = vmatmul.f32.gmra.mxu2 %v1901_v38  ;;  %965 = vmatpush.msrb.mxu1 %v964_v41 }
  0xd8   : > { %971 = vmatpush.msrb.mxu1 %v970_v18 }
  0xda   : > { %977 = vmatpush.msrb.mxu1 %v976_v51 }
  0xdb   : > { %566 = vmatmul.f32.gmra.mxu0 %v1881_v43  ;;  %599 = vmatmul.f32.gmra.mxu1 %v1827_v42 }
  0xdc   : > { %709 = vmatmul.f32.gmra.mxu3 %v1881_v43 }
  0xde   : > { %652 = vmatmul.f32.gmra.mxu2 %v1939_v31 }
  0xe3   : > { %570 = vmatmul.f32.gmra.mxu0 %v1905_v39  ;;  %603 = vmatmul.f32.gmra.mxu1 %v1881_v43 }
  0xe4   : > { %713 = vmatmul.f32.gmra.mxu3 %v1905_v39 }
  0xe6   : > { %660 = vmatmul.f32.gmra.mxu2 %v1968_v61 }
  0xeb   : > { %743 = vmatmul.f32.vlgmr.msra.gmra.mxu0 %v1785_v60  ;;  %607 = vmatmul.f32.gmra.mxu1 %v1905_v39 }
  0xec   : > { %873 = vmatmul.f32.vlgmr.msra.gmra.mxu3 %v1770_v49  ;;  %1100 = vmatpush.msra.mxu0 %v956_v2 }
  0xed   : > { %1237 = vmatpush.msra.mxu3 %v1236_v55 }
  0xee   : > { %836 = vmatmul.f32.vlgmr.msra.gmra.mxu2 %v1770_v49  ;;  %1104 = vmatpush.msra.mxu0 %v962_v56 }
  0xef   : > { %1180 = vmatpush.msra.mxu2 %v2043_v14  ;;  %1243 = vmatpush.msra.mxu3 %v1242_v12 }
  0xf0   : > { %1108 = vmatpush.msra.mxu0 %v968_v15  ;;  %v2149_v15 = vpop.permute.xlu2 %313 }
  0xf1   : > { %1182 = vmatpush.msra.mxu2 %v2048_v59  ;;  %1249 = vmatpush.msra.mxu3 %v1248_v22 }
  0xf2   : > { %1112 = vmatpush.msra.mxu0 %v974_v20 }
  0xf3   : > { %1184 = vmatpush.msra.mxu2 %v2054_v47  ;;  %1255 = vmatpush.msra.mxu3 %v1254_v24 }
  0xf4   : > { %748 = vmatmul.f32.gmra.mxu0 %v1848_v3  ;;  %785 = vmatmul.f32.vlgmr.msra.gmra.mxu1 %v1809_v27 }
  0xf5   : > { %877 = vmatmul.f32.gmra.mxu3 %v1827_v42  ;;  %1143 = vmatpush.msra.mxu1 %v1975_v35  ;;  %v149_v35 = vld [vmem:[%s2240_s1] sm:$0x1] }
  0xf6   : > { %1186 = vmatpush.msra.mxu2 %v2059_v29  ;;  %1531 = vperm.xlu2 %1646, %v149_v35  }
  0xf7   : > { %840 = vmatmul.f32.gmra.mxu2 %v1827_v42  ;;  %1145 = vmatpush.msra.mxu1 %v1979_v36 }
  0xf9   : > { %1147 = vmatpush.msra.mxu1 %v1985_v58 }
  0xfb   : > { %1149 = vmatpush.msra.mxu1 %v1991_v4 }
  0xfc   : > { %753 = vmatmul.f32.gmra.mxu0 %v1895_v9  ;;  %791 = vmatmul.f32.gmra.mxu1 %v1875_v37 }
  0xfd   : > { %881 = vmatmul.f32.gmra.mxu3 %v1881_v43 }
  0xff   : > { %844 = vmatmul.f32.gmra.mxu2 %v1881_v43 }
 0x101   : > { %v2141_v5 = vpop.permute.xlu1 %309 }
 0x104   : > { %758 = vmatmul.f32.gmra.mxu0 %v1918_v30  ;;  %797 = vmatmul.f32.gmra.mxu1 %v1909_v13 }
 0x105   : > { %885 = vmatmul.f32.gmra.mxu3 %v1905_v39 }
 0x107   : > { %848 = vmatmul.f32.gmra.mxu2 %v1905_v39 }
 0x109   : > { %v2156_v7 = vpop.permute.xlu1 %317 }
 0x10c   : > { %914 = vmatmul.f32.vlgmr.msrb.gmra.mxu0 %v1854_v8  ;;  %803 = vmatmul.f32.gmra.mxu1 %v1942_v54 }
 0x10d   : > { %1063 = vmatmul.f32.vlgmr.msrb.gmra.mxu3 %v1809_v27  ;;  %1287 = vmatpush.msrb.mxu0 %v2052_v16 }
 0x10e   : > { %1421 = vmatpush.msrb.mxu3 %v2043_v14 }
 0x10f   : > { %1021 = vmatmul.f32.vlgmr.msrb.gmra.mxu2 %v1785_v60  ;;  %1290 = vmatpush.msrb.mxu0 %v2057_v62 }
 0x110   : > { %1378 = vmatpush.msrb.mxu2 %v1234_v21  ;;  %1423 = vmatpush.msrb.mxu3 %v2048_v59 }
 0x111   : > { %1293 = vmatpush.msrb.mxu0 %v2064_v32 }
 0x112   : > { %1382 = vmatpush.msrb.mxu2 %v1240_v19  ;;  %1425 = vmatpush.msrb.mxu3 %v2054_v47 }
 0x113   : > { %1296 = vmatpush.msrb.mxu0 %v2069_v34 }
 0x114   : > { %1386 = vmatpush.msrb.mxu2 %v1246_v57  ;;  %1427 = vmatpush.msrb.mxu3 %v2059_v29 }
 0x115   : > { %922 = vmatmul.f32.gmra.mxu0 %v1901_v38  ;;  %979 = vmatmul.f32.vlgmr.msrb.gmra.mxu1 %v1770_v49 }
 0x116   : > { %1390 = vmatpush.msrb.mxu2 %v1252_v50  ;;  %1331 = vmatpush.msrb.mxu1 %v2043_v14  ;;  %v2163_v14 = vpop.permute.xlu2 %321 }
 0x117   : > { %1026 = vmatmul.f32.gmra.mxu2 %v1848_v3  ;;  %1069 = vmatmul.f32.gmra.mxu3 %v1875_v37 }
 0x118   : > { %1333 = vmatpush.msrb.mxu1 %v2048_v59 }
 0x11a   : > { %1335 = vmatpush.msrb.mxu1 %v2054_v47 }
 0x11c   : > { %1337 = vmatpush.msrb.mxu1 %v2059_v29 }
 0x11d   : > { %930 = vmatmul.f32.gmra.mxu0 %v1939_v31  ;;  %983 = vmatmul.f32.gmra.mxu1 %v1827_v42 }
 0x11f   : > { %1031 = vmatmul.f32.gmra.mxu2 %v1895_v9  ;;  %1075 = vmatmul.f32.gmra.mxu3 %v1909_v13 }
 0x123   : > { %v359_v36 = vpop.f32.mrf.mxu0 }
 0x124   : > { %v360_v58 = vadd.f32 %v359_v36, %v2141_v5 }
 0x125   : > { %938 = vmatmul.f32.gmra.mxu0 %v1968_v61  ;;  %987 = vmatmul.f32.gmra.mxu1 %v1881_v43 }
 0x127   : > { %1036 = vmatmul.f32.gmra.mxu2 %v1918_v30  ;;  %1081 = vmatmul.f32.gmra.mxu3 %v1942_v54 }
 0x12a   : > { %v508_v52 = vpop.f32.mrf.mxu3 }
 0x12c   : > { %v424_v4 = vpop.f32.mrf.mxu1  ;;  %v466_v6 = vpop.f32.mrf.mxu2 }
 0x12d   : > { %1114 = vmatmul.f32.vlgmr.msra.gmra.mxu0 %v1770_v49  ;;  %991 = vmatmul.f32.gmra.mxu1 %v1905_v39  ;;  %v425_v1 = vadd.f32 %v424_v4, %v360_v58 }
 0x12e   : > { %v367_v2 = vpop.f32.mrf.mxu0 }
 0x12f   : > { %1192 = vmatmul.f32.vlgmr.msra.gmra.mxu2 %v1854_v8  ;;  %1257 = vmatmul.f32.vlgmr.msra.gmra.mxu3 %v1770_v49  ;;  %v467_v56 = vadd.f32 %v466_v6, %v425_v1  ;;  %v368_v33 = vadd.f32 %v367_v2, %v2149_v15  ;;  %v2180_v36 = vpop.permute.xlu0 %1462 }
 0x131   : > { %v509_v11 = vadd.f32 %v508_v52, %v467_v56  ;;  %v2182_v58 = vpop.permute.xlu1 %1466 }
 0x133   : > { %v514_v20 = vpop.f32.mrf.mxu3 }
 0x135   : > { %1118 = vmatmul.f32.gmra.mxu0 %v1827_v42  ;;  %1151 = vmatmul.f32.vlgmr.msra.gmra.mxu1 %v1770_v49 }
 0x136   : > { %v375_v0 = vpop.f32.mrf.mxu0 }
 0x137   : > { %1200 = vmatmul.f32.gmra.mxu2 %v1901_v38  ;;  %1261 = vmatmul.f32.gmra.mxu3 %v1827_v42  ;;  %v376_v18 = vadd.f32 %v375_v0, %v2156_v7 }
 0x138   : > { %v428_v25 = vpop.f32.mrf.mxu1  ;;  %v471_v41 = vpop.f32.mrf.mxu2 }
 0x139   : > { %v429_v8 = vadd.f32 %v428_v25, %v368_v33 }
 0x13b   : > { %v472_v45 = vadd.f32 %v471_v41, %v429_v8 }
 0x13d   : > { %1122 = vmatmul.f32.gmra.mxu0 %v1881_v43  ;;  %v515_v46 = vadd.f32 %v514_v20, %v472_v45  ;;  %1155 = vmatmul.f32.gmra.mxu1 %v1827_v42 }
 0x13e   : > { %v520_v48 = vpop.f32.mrf.mxu3  ;;  %v383_v38 = vpop.f32.mrf.mxu0 }
 0x13f   : > { %1208 = vmatmul.f32.gmra.mxu2 %v1939_v31  ;;  %1265 = vmatmul.f32.gmra.mxu3 %v1881_v43  ;;  %v384_v28 = vadd.f32 %v383_v38, %v2163_v14 }
 0x140   : > { %v432_v51 = vpop.f32.mrf.mxu1  ;;  %v476_v10 = vpop.f32.mrf.mxu2 }
 0x141   : > { %v433_v40 = vadd.f32 %v432_v51, %v376_v18  ;;  %v2199_v51 = vpop.permute.xlu1 %1474 }
 0x143   : > { %v477_v44 = vadd.f32 %v476_v10, %v433_v40 }
 0x145   : > { %1126 = vmatmul.f32.gmra.mxu0 %v1905_v39  ;;  %v521_v59 = vadd.f32 %v520_v48, %v477_v44  ;;  %1159 = vmatmul.f32.gmra.mxu1 %v1881_v43 }
 0x146   : > { %v526_v31 = vpop.f32.mrf.mxu3  ;;  %v559_v47 = vpop.f32.mrf.mxu0 }
 0x147   : > { %1216 = vmatmul.f32.gmra.mxu2 %v1968_v61  ;;  %1269 = vmatmul.f32.gmra.mxu3 %v1905_v39  ;;  %v560_v29 = vadd.f32 %v559_v47, %v509_v11 }
 0x148   : > { %v436_v16 = vpop.f32.mrf.mxu1  ;;  %v481_v21 = vpop.f32.mrf.mxu2 }
 0x149   : > { %v437_v62 = vadd.f32 %v436_v16, %v384_v28 }
 0x14b   : > { %v482_v32 = vadd.f32 %v481_v21, %v437_v62 }
 0x14d   : > { %1299 = vmatmul.f32.vlgmr.msrb.gmra.mxu0 %v1785_v60  ;;  %v527_v34 = vadd.f32 %v526_v31, %v482_v32  ;;  %1163 = vmatmul.f32.gmra.mxu1 %v1905_v39 }
 0x14e   : > { %v702_v19 = vpop.f32.mrf.mxu3 }
 0x14f   : > { %1392 = vmatmul.f32.vlgmr.msrb.gmra.mxu2 %v1770_v49  ;;  %1429 = vmatmul.f32.vlgmr.msrb.gmra.mxu3 %v1770_v49 }
 0x150   : > { %v563_v63 = vpop.f32.mrf.mxu0  ;;  %v596_v57 = vpop.f32.mrf.mxu1 }
 0x151   : > { %v564_v61 = vadd.f32 %v563_v63, %v515_v46  ;;  %v637_v17 = vpop.f32.mrf.mxu2  ;;  %v597_v50 = vadd.f32 %v596_v57, %v560_v29 }
 0x152   : > { %v638_v55 = vadd.f32 %v637_v17, %v2141_v5 }
 0x153   : > { %v1445_v24 = vmax.f32 %v597_v50, 0.0 }
 0x154   : > { %v703_v23 = vadd.f32 %v702_v19, %v638_v55 }
 0x155   : > { %1304 = vmatmul.f32.gmra.mxu0 %v1848_v3  ;;  %1341 = vmatmul.f32.vlgmr.msrb.gmra.mxu1 %v1809_v27  ;;  %v1477_v27 = vmul.f32 %v2180_v36, %v1445_v24 }
 0x157   : > { %1396 = vmatmul.f32.gmra.mxu2 %v1827_v42  ;;  %v706_v60 = vpop.f32.mrf.mxu3  ;;  %1433 = vmatmul.f32.gmra.mxu3 %v1827_v42 }
 0x158   : > { %v567_v12 = vpop.f32.mrf.mxu0  ;;  %v600_v22 = vpop.f32.mrf.mxu1 }
 0x159   : > { %v568_v53 = vadd.f32 %v567_v12, %v521_v59  ;;  %v645_v49 = vpop.f32.mrf.mxu2  ;;  %v601_v26 = vadd.f32 %v600_v22, %v564_v61 }
 0x15a   : > { %v646_v35 = vadd.f32 %v645_v49, %v2149_v15 }
 0x15b   : > { %v1449_v3 = vmax.f32 %v601_v26, 0.0 }
 0x15c   : > { %v707_v52 = vadd.f32 %v706_v60, %v646_v35 }
 0x15d   : > { %1309 = vmatmul.f32.gmra.mxu0 %v1895_v9  ;;  %1347 = vmatmul.f32.gmra.mxu1 %v1875_v37  ;;  %v1481_v42 = vmul.f32 %v2182_v58, %v1449_v3  ;;  %v2191_v9 = vpop.permute.xlu2 %1470 }
 0x15f   : > { %1400 = vmatmul.f32.gmra.mxu2 %v1881_v43  ;;  %v710_v4 = vpop.f32.mrf.mxu3  ;;  %v1493_v6 = vadd.f32 %v1481_v42, %v1477_v27  ;;  %1437 = vmatmul.f32.gmra.mxu3 %v1881_v43 }
 0x160   : > { %v571_v2 = vpop.f32.mrf.mxu0  ;;  %v604_v56 = vpop.f32.mrf.mxu1 }
 0x161   : > { %v572_v1 = vadd.f32 %v571_v2, %v527_v34  ;;  %v653_v11 = vpop.f32.mrf.mxu2  ;;  %v605_v33 = vadd.f32 %v604_v56, %v568_v53 }
 0x162   : > { %v654_v20 = vadd.f32 %v653_v11, %v2156_v7 }
 0x163   : > { %v1453_v0 = vmax.f32 %v605_v33, 0.0 }
 0x164   : > { %v711_v25 = vadd.f32 %v710_v4, %v654_v20 }
 0x165   : > { %1314 = vmatmul.f32.gmra.mxu0 %v1918_v30  ;;  %1353 = vmatmul.f32.gmra.mxu1 %v1909_v13  ;;  %v1485_v37 = vmul.f32 %v2191_v9, %v1453_v0 }
 0x167   : > { %1404 = vmatmul.f32.gmra.mxu2 %v1905_v39  ;;  %v714_v8 = vpop.f32.mrf.mxu3  ;;  %1441 = vmatmul.f32.gmra.mxu3 %v1905_v39  ;;  %v1494_v41 = vadd.f32 %v1493_v6, %v1485_v37 }
 0x168   : > { %v744_v43 = vpop.f32.mrf.mxu0  ;;  %v608_v45 = vpop.f32.mrf.mxu1 }
 0x169   : > { %v745_v46 = vadd.f32 %v744_v43, %v703_v23  ;;  %v661_v18 = vpop.f32.mrf.mxu2  ;;  %v609_v48 = vadd.f32 %v608_v45, %v572_v1 }
 0x16a   : > { %v662_v38 = vadd.f32 %v661_v18, %v2163_v14 }
 0x16b   : > { %v1457_v30 = vmax.f32 %v609_v48, 0.0 }
 0x16c   : > { %v715_v40 = vadd.f32 %v714_v8, %v662_v38 }
 0x16d   : > { %1359 = vmatmul.f32.gmra.mxu1 %v1942_v54  ;;  %v1489_v13 = vmul.f32 %v2199_v51, %v1457_v30 }
 0x16f   : > { %v874_v10 = vpop.f32.mrf.mxu3  ;;  %v1495_v44 = vadd.f32 %v1494_v41, %v1489_v13 }
 0x171   : > { %v749_v59 = vpop.f32.mrf.mxu0  ;;  %v837_v28 = vpop.f32.mrf.mxu2  ;;  %v1496_v1 = vrot.slane %v1495_v44, 4 }
 0x172   : > { %v750_v39 = vadd.f32 %v749_v59, %v707_v52  ;;  %v786_v31 = vpop.f32.mrf.mxu1 }
 0x173   : > { %v787_v16 = vadd.f32 %v786_v31, %v745_v46  ;;  %v1497_v0 = vadd.f32 %v1496_v1, %v1495_v44 }
 0x175   : > { %v838_v47 = vadd.f32 %v837_v28, %v787_v16  ;;  %v1498_v18 = vrot.slane %v1497_v0, 2 }
 0x177   : > { %v875_v62 = vadd.f32 %v874_v10, %v838_v47  ;;  %v1499_v10 = vadd.f32 %v1498_v18, %v1497_v0 }
 0x178   : > { %v878_v29 = vpop.f32.mrf.mxu3 }
 0x179   : > { %v754_v21 = vpop.f32.mrf.mxu0  ;;  %v1446_v57 = vmax.f32 %v875_v62, 0.0  ;;  %v1500_v62 = vrot.slane %v1499_v10, 1 }
 0x17a   : > { %v755_v32 = vadd.f32 %v754_v21, %v711_v25  ;;  %v792_v34 = vpop.f32.mrf.mxu1  ;;  %v841_v19 = vpop.f32.mrf.mxu2 }
 0x17b   : > { %v793_v63 = vadd.f32 %v792_v34, %v750_v39  ;;  %v1478_v53 = vmul.f32 %v2180_v36, %v1446_v57 }
 0x17d   : > { %v842_v61 = vadd.f32 %v841_v19, %v793_v63  ;;  %v2210_v63 = vpop.permute.xlu2 %1531 }
 0x17f   : > { %v879_v54 = vadd.f32 %v878_v29, %v842_v61  ;;  %v1501_v61 = vadd.f32 %v1500_v62, %v1499_v10 }
 0x180   : > { %v882_v17 = vpop.f32.mrf.mxu3 }
 0x181   : > { %v1450_v50 = vmax.f32 %v879_v54, 0.0  ;;  %v759_v55 = vpop.f32.mrf.mxu0 }
 0x182   : > { %v760_v23 = vadd.f32 %v759_v55, %v715_v40  ;;  %v798_v60 = vpop.f32.mrf.mxu1  ;;  %v845_v12 = vpop.f32.mrf.mxu2 }
 0x183   : > { %v1482_v22 = vmul.f32 %v2182_v58, %v1450_v50  ;;  %v799_v49 = vadd.f32 %v798_v60, %v755_v32 }
 0x185   : > { %v1502_v24 = vadd.f32 %v1482_v22, %v1478_v53  ;;  %v846_v26 = vadd.f32 %v845_v12, %v799_v49  ;;  %v1534_v12 = vadd.f32 %v2210_v63, %v1501_v61 }
 0x187   : > { %v883_v35 = vadd.f32 %v882_v17, %v846_v26 }
 0x188   : > { %v886_v3 = vpop.f32.mrf.mxu3 }
 0x189   : > { %v1454_v52 = vmax.f32 %v883_v35, 0.0  ;;  %v915_v27 = vpop.f32.mrf.mxu0 }
 0x18a   : > { %v804_v42 = vpop.f32.mrf.mxu1  ;;  %v849_v4 = vpop.f32.mrf.mxu2  ;;  %v916_v20 = vadd.f32 %v915_v27, %v2141_v5 }
 0x18b   : > { %v1486_v6 = vmul.f32 %v2191_v9, %v1454_v52  ;;  %v805_v2 = vadd.f32 %v804_v42, %v760_v23 }
 0x18d   : > { %v1503_v56 = vadd.f32 %v1502_v24, %v1486_v6  ;;  %v850_v11 = vadd.f32 %v849_v4, %v805_v2 }
 0x18f   : > { %v887_v33 = vadd.f32 %v886_v3, %v850_v11 }
 0x190   : > { %v1064_v37 = vpop.f32.mrf.mxu3 }
 0x191   : > { %v1458_v25 = vmax.f32 %v887_v33, 0.0 }
 0x192   : > { %v923_v8 = vpop.f32.mrf.mxu0  ;;  %v1022_v43 = vpop.f32.mrf.mxu2 }
 0x193   : > { %v1490_v41 = vmul.f32 %v2199_v51, %v1458_v25  ;;  %v980_v45 = vpop.f32.mrf.mxu1  ;;  %v924_v40 = vadd.f32 %v923_v8, %v2149_v15 }
 0x194   : > { %v981_v46 = vadd.f32 %v980_v45, %v916_v20 }
 0x195   : > { %v1504_v48 = vadd.f32 %v1503_v56, %v1490_v41 }
 0x196   : > { %v1023_v38 = vadd.f32 %v1022_v43, %v981_v46 }
 0x197   : > { %v1505_v30 = vrot.slane %v1504_v48, 4 }
 0x198   : > { %v1065_v13 = vadd.f32 %v1064_v37, %v1023_v38 }
 0x199   : > { %v1506_v59 = vadd.f32 %v1505_v30, %v1504_v48 }
 0x19a   : > { %v931_v28 = vpop.f32.mrf.mxu0  ;;  %v1027_v39 = vpop.f32.mrf.mxu2 }
 0x19b   : > { %v1507_v44 = vrot.slane %v1506_v59, 2  ;;  %v984_v31 = vpop.f32.mrf.mxu1  ;;  %v1070_v16 = vpop.f32.mrf.mxu3  ;;  %v932_v34 = vadd.f32 %v931_v28, %v2156_v7 }
 0x19c   : > { %v985_v47 = vadd.f32 %v984_v31, %v924_v40 }
 0x19d   : > { %v1508_v29 = vadd.f32 %v1507_v44, %v1506_v59 }
 0x19e   : > { %v1028_v21 = vadd.f32 %v1027_v39, %v985_v47 }
 0x19f   : > { %v1509_v32 = vrot.slane %v1508_v29, 1 }
 0x1a0   : > { %v1071_v19 = vadd.f32 %v1070_v16, %v1028_v21 }
 0x1a1   : > { %v1510_v57 = vadd.f32 %v1509_v32, %v1508_v29 }
 0x1a2   : > { %v939_v54 = vpop.f32.mrf.mxu0  ;;  %v1032_v17 = vpop.f32.mrf.mxu2 }
 0x1a3   : > { %v1535_v50 = vadd.f32 %v2210_v63, %v1510_v57  ;;  %v988_v55 = vpop.f32.mrf.mxu1  ;;  %v1076_v23 = vpop.f32.mrf.mxu3  ;;  %v940_v59 = vadd.f32 %v939_v54, %v2163_v14 }
 0x1a4   : > { %v989_v60 = vadd.f32 %v988_v55, %v932_v34 }
 0x1a5   : > { %v1542_v53 = vrot.slane %v1535_v50, 7 }
 0x1a6   : > { %v1033_v22 = vadd.f32 %v1032_v17, %v989_v60 }
 0x1a7   : > { %v2214_v49 = vsel %vm1545_vm1, %v1534_v12, %v1542_v53 }
 0x1a8   : > { %v1077_v24 = vadd.f32 %v1076_v23, %v1033_v22 }
 0x1aa   : > { %v1115_v26 = vpop.f32.mrf.mxu0  ;;  %v1037_v35 = vpop.f32.mrf.mxu2 }
 0x1ab   : > { %v992_v3 = vpop.f32.mrf.mxu1  ;;  %v1082_v52 = vpop.f32.mrf.mxu3  ;;  %v1116_v2 = vadd.f32 %v1115_v26, %v1065_v13 }
 0x1ac   : > { %v993_v47 = vadd.f32 %v992_v3, %v940_v59 }
 0x1ae   : > { %v1038_v62 = vadd.f32 %v1037_v35, %v993_v47 }
 0x1b2   : > { %v1119_v27 = vpop.f32.mrf.mxu0  ;;  %v1193_v42 = vpop.f32.mrf.mxu2 }
 0x1b3   : > { %v1152_v4 = vpop.f32.mrf.mxu1  ;;  %v1258_v6 = vpop.f32.mrf.mxu3  ;;  %v1120_v56 = vadd.f32 %v1119_v27, %v1071_v19  ;;  %v1083_v19 = vadd.f32 %v1082_v52, %v1038_v62  ;;  %v1194_v57 = vadd.f32 %v1193_v42, %v2141_v5 }
 0x1b4   : > { %v1153_v1 = vadd.f32 %v1152_v4, %v1116_v2 }
 0x1b5   : > { %v1259_v12 = vadd.f32 %v1258_v6, %v1194_v57 }
 0x1b6   : > { %v1447_v25 = vmax.f32 %v1153_v1, 0.0 }
 0x1b8   : > { %v1479_v43 = vmul.f32 %v2180_v36, %v1447_v25 }
 0x1ba   : > { %v1123_v11 = vpop.f32.mrf.mxu0  ;;  %v1201_v33 = vpop.f32.mrf.mxu2 }
 0x1bb   : > { %v1156_v20 = vpop.f32.mrf.mxu1  ;;  %v1262_v0 = vpop.f32.mrf.mxu3  ;;  %v1124_v45 = vadd.f32 %v1123_v11, %v1077_v24  ;;  %v1202_v61 = vadd.f32 %v1201_v33, %v2149_v15 }
 0x1bc   : > { %v1157_v37 = vadd.f32 %v1156_v20, %v1120_v56 }
 0x1bd   : > { %v1263_v50 = vadd.f32 %v1262_v0, %v1202_v61 }
 0x1be   : > { %v1451_v8 = vmax.f32 %v1157_v37, 0.0 }
 0x1c0   : > { %v1483_v41 = vmul.f32 %v2182_v58, %v1451_v8 }
 0x1c2   : > { %v1511_v46 = vadd.f32 %v1483_v41, %v1479_v43  ;;  %v1127_v18 = vpop.f32.mrf.mxu0  ;;  %v1209_v48 = vpop.f32.mrf.mxu2 }
 0x1c3   : > { %v1160_v38 = vpop.f32.mrf.mxu1  ;;  %v1266_v30 = vpop.f32.mrf.mxu3  ;;  %v1128_v17 = vadd.f32 %v1127_v18, %v1083_v19  ;;  %v1210_v53 = vadd.f32 %v1209_v48, %v2156_v7 }
 0x1c4   : > { %v1161_v40 = vadd.f32 %v1160_v38, %v1124_v45 }
 0x1c5   : > { %v1267_v27 = vadd.f32 %v1266_v30, %v1210_v53 }
 0x1c6   : > { %v1455_v13 = vmax.f32 %v1161_v40, 0.0 }
 0x1c8   : > { %v1487_v10 = vmul.f32 %v2191_v9, %v1455_v13 }
 0x1ca   : > { %v1512_v28 = vadd.f32 %v1511_v46, %v1487_v10  ;;  %v1300_v39 = vpop.f32.mrf.mxu0  ;;  %v1217_v44 = vpop.f32.mrf.mxu2 }
 0x1cb   : > { %v1164_v31 = vpop.f32.mrf.mxu1  ;;  %v1270_v16 = vpop.f32.mrf.mxu3  ;;  %v1301_v35 = vadd.f32 %v1300_v39, %v1259_v12  ;;  %v1218_v56 = vadd.f32 %v1217_v44, %v2163_v14 }
 0x1cc   : > { %v1165_v55 = vadd.f32 %v1164_v31, %v1128_v17 }
 0x1cd   : > { %v1271_v25 = vadd.f32 %v1270_v16, %v1218_v56 }
 0x1ce   : > { %v1459_v26 = vmax.f32 %v1165_v55, 0.0 }
 0x1d0   : > { %v1491_v15 = vmul.f32 %v2199_v51, %v1459_v26 }
 0x1d2   : > { %v1305_v29 = vpop.f32.mrf.mxu0  ;;  %v1393_v21 = vpop.f32.mrf.mxu2  ;;  %v1513_v33 = vadd.f32 %v1512_v28, %v1491_v15 }
 0x1d3   : > { %v1342_v32 = vpop.f32.mrf.mxu1  ;;  %v1430_v34 = vpop.f32.mrf.mxu3  ;;  %v1306_v22 = vadd.f32 %v1305_v29, %v1263_v50  ;;  %v1552_v50 = vlaneseq }
 0x1d4   : > { %v1343_v52 = vadd.f32 %v1342_v32, %v1301_v35  ;;  %v1514_v43 = vrot.slane %v1513_v33, 4 }
 0x1d5   : > { %vm1554_vm4 = vcmp.lt.s32.totalorder %v1552_v50, 512 }
 0x1d6   : > { %v1394_v11 = vadd.f32 %v1393_v21, %v1343_v52  ;;  %v1515_v13 = vadd.f32 %v1514_v43, %v1513_v33 }
 0x1d8   : > { %v1431_v37 = vadd.f32 %v1430_v34, %v1394_v11  ;;  %v1516_v44 = vrot.slane %v1515_v13, 2 }
 0x1da   : > { %v1397_v54 = vpop.f32.mrf.mxu2  ;;  %v1310_v24 = vpop.f32.mrf.mxu0  ;;  %v1448_v48 = vmax.f32 %v1431_v37, 0.0  ;;  %v1517_v29 = vadd.f32 %v1516_v44, %v1515_v13 }
 0x1db   : > { %v1348_v23 = vpop.f32.mrf.mxu1  ;;  %v1434_v60 = vpop.f32.mrf.mxu3  ;;  %v1311_v4 = vadd.f32 %v1310_v24, %v1267_v27 }
 0x1dc   : > { %v1349_v3 = vadd.f32 %v1348_v23, %v1306_v22  ;;  %v1480_v59 = vmul.f32 %v2180_v36, %v1448_v48  ;;  %v1518_v34 = vrot.slane %v1517_v29, 1 }
 0x1de   : > { %v1398_v5 = vadd.f32 %v1397_v54, %v1349_v3 }
 0x1e0   : > { %v1435_v7 = vadd.f32 %v1434_v60, %v1398_v5 }
 0x1e2   : > { %v1401_v42 = vpop.f32.mrf.mxu2  ;;  %v1315_v0 = vpop.f32.mrf.mxu0  ;;  %v1452_v41 = vmax.f32 %v1435_v7, 0.0 }
 0x1e3   : > { %v1354_v2 = vpop.f32.mrf.mxu1  ;;  %v1438_v1 = vpop.f32.mrf.mxu3  ;;  %v1316_v45 = vadd.f32 %v1315_v0, %v1271_v25 }
 0x1e4   : > { %v1355_v6 = vadd.f32 %v1354_v2, %v1311_v4  ;;  %v1484_v14 = vmul.f32 %v2182_v58, %v1452_v41  ;;  %v1519_v58 = vadd.f32 %v1518_v34, %v1517_v29 }
 0x1e6   : > { %v1402_v20 = vadd.f32 %v1401_v42, %v1355_v6  ;;  %v1520_v31 = vadd.f32 %v1484_v14, %v1480_v59  ;;  %v1536_v36 = vadd.f32 %v2210_v63, %v1519_v58 }
 0x1e8   : > { %v1439_v8 = vadd.f32 %v1438_v1, %v1402_v20  ;;  %v1543_v54 = vrot.slane %v1536_v36, 6 }
 0x1ea   : > { %v1405_v18 = vpop.f32.mrf.mxu2  ;;  %v1456_v38 = vmax.f32 %v1439_v8, 0.0 }
 0x1eb   : > { %v1360_v46 = vpop.f32.mrf.mxu1  ;;  %v1442_v40 = vpop.f32.mrf.mxu3 }
 0x1ec   : > { %v1361_v30 = vadd.f32 %v1360_v46, %v1316_v45  ;;  %v1488_v28 = vmul.f32 %v2191_v9, %v1456_v38 }
 0x1ee   : > { %v1406_v10 = vadd.f32 %v1405_v18, %v1361_v30  ;;  %v1521_v47 = vadd.f32 %v1520_v31, %v1488_v28 }
 0x1f0   : > { %v1443_v39 = vadd.f32 %v1442_v40, %v1406_v10 }
 0x1f2   : > { %v1460_v16 = vmax.f32 %v1443_v39, 0.0 }
 0x1f4   : > { %v1492_v62 = vmul.f32 %v2199_v51, %v1460_v16 }
 0x1f6   : > { %v1522_v21 = vadd.f32 %v1521_v47, %v1492_v62 }
 0x1f8   : > { %v1523_v32 = vrot.slane %v1522_v21, 4 }
 0x1fa   : > { %v1524_v19 = vadd.f32 %v1523_v32, %v1522_v21 }
 0x1fc   : > { %v1525_v61 = vrot.slane %v1524_v19, 2 }
 0x1fe   : > { %v1526_v57 = vadd.f32 %v1525_v61, %v1524_v19 }
 0x200   : > { %v1527_v17 = vrot.slane %v1526_v57, 1 }
 0x202   : > { %v1528_v9 = vadd.f32 %v1527_v17, %v1526_v57 }
 0x204   : > { %v1537_v55 = vadd.f32 %v2210_v63, %v1528_v9 }
 0x206   : > { %v1544_v23 = vrot.slane %v1537_v55, 5 }
 0x208   : > { %v1548_v51 = vsel %vm1547_vm2, %v1543_v54, %v1544_v23 }
 0x209   : > { %v1550_v60 = vsel %vm1549_vm3, %v2214_v49, %v1548_v51 }
 0x20a   : > { %1556 = vst.msk [vmem:[%s143_s28] sm:$0xf] %vm1554_vm4, %v1550_v60 }
 0x20b PF: > { %s12_s9 = sadd.s32 1, %s1654_s9  }
 0x20c   : > { %p9_p4 = scmp.ge.s32.totalorder %s12_s9, 4  }
 0x20e   :  { %11 = sbr.rel (!%p9_p4) target bundleno = 1 (0x1), region = 58 }

</bundles_post_ra>
